<compile_context>
chip_gen: v7x
topology: tpu7x:2x2x1
jax: 0.10.0
libtpu: 0.0.40
codegen_flags: <defaults>
</compile_context>

<pallas_src>
import jax
import jax.numpy as jnp
from jax.experimental import pallas as pl
from jax.experimental.pallas import tpu as pltpu


def _cdiv(a, b):
    return -(-a // b)


def _round_up(x, m):
    return _cdiv(x, m) * m


def _tile_bytes(rows, h, w, dtype):
    """VMEM footprint of a (rows, h, w) block in Mosaic's tiled (sublane,lane) layout."""
    item = jnp.dtype(dtype).itemsize
    sub = max(8, 32 // item)          # (8,128) f32 tiles, (16,128) bf16, (32,128) int8
    return rows * _round_up(max(h, 1), sub) * _round_up(max(w, 1), 128) * item


def _interp_matrix_t(out_n, in_n, origin, spacing, dtype):
    """(in_n, out_n) TRANSPOSED 1-D linear-interp matrix (clamp-to-edge boundary).

    Output index i samples the input at x = origin + spacing*(i - (out_n-1)/2),
    matching lagomorph's regrid_forward.  Built transposed directly (no XLA
    transpose of the weight needed)."""
    i = jnp.arange(out_n, dtype=jnp.float32)
    x = origin + spacing * (i - 0.5 * (out_n - 1))
    x0 = jnp.floor(x)
    w1 = x - x0
    w0 = 1.0 - w1
    i0 = jnp.clip(x0.astype(jnp.int32), 0, in_n - 1)
    i1 = jnp.clip(x0.astype(jnp.int32) + 1, 0, in_n - 1)
    rows = jnp.arange(in_n, dtype=jnp.int32)[:, None]         # input index (rows of W^T)
    wt = (w0[None, :] * (rows == i0[None, :]).astype(jnp.float32)
          + w1[None, :] * (rows == i1[None, :]).astype(jnp.float32))
    return wt.astype(dtype)                                    # (in_n, out_n)


def _regrid_kernel(i_ref, wxt_ref, wyt_ref, o_ref):
    # i_ref   : (Bt, Hin, Win)    batch tile, native wire dtype
    # wxt_ref : (Win, Wout)       resident W-interp weight (transposed), compute dtype
    # wyt_ref : (Hin, Hout)       resident H-interp weight (transposed), compute dtype
    # o_ref   : (Bt, Hout, Wout)  output tile
    bt, hin, win = i_ref.shape
    wout = wxt_ref.shape[1]
    hout = wyt_ref.shape[1]
    cdt = wxt_ref.dtype

    x = i_ref[...].astype(cdt)                                  # upcast on VPU, in VMEM

    # Stage 1 — interpolate along W (lane axis): one plain dense MXU GEMM.
    t = jnp.dot(x.reshape(bt * hin, win), wxt_ref[...],
                preferred_element_type=jnp.float32)             # (Bt*Hin, Wout), f32 acc

    # Stage 2 — interpolate along H: minor-dim transpose (XLU) + second dense GEMM.
    t = jnp.transpose(t.reshape(bt, hin, wout).astype(cdt), (0, 2, 1))   # (Bt, Wout, Hin)
    o = jnp.dot(t.reshape(bt * wout, hin), wyt_ref[...],
                preferred_element_type=jnp.float32)             # (Bt*Wout, Hout), f32 acc
    o = jnp.transpose(o.reshape(bt, wout, hout), (0, 2, 1))     # (Bt, Hout, Wout)

    o_ref[...] = o.astype(o_ref.dtype)


def regrid_forward(I, outshape, origin=None, spacing=None):
    """Pallas equivalent of lagomorph_cuda.regrid_forward for 2-D images (NCHW)."""
    N, C, Hin, Win = I.shape
    d = 2
    if not isinstance(outshape, (list, tuple)):
        outshape = (outshape,) * d
    Hout, Wout = int(outshape[0]), int(outshape[1])

    # Same default rules / supported branches as the PyTorch `regrid` wrapper.
    if origin is None:
        origin = ((Hin - 1) * 0.5, (Win - 1) * 0.5)
        if spacing is None:
            # max(.,1) guards outshape==1 (PyTorch would divide by zero there).
            spacing = ((Hin - 1) / max(Hout - 1, 1), (Win - 1) / max(Wout - 1, 1))
    else:
        # (shape, origin[, spacing]) branches raise in the PyTorch wrapper too.
        raise NotImplementedError("regrid: origin override not supported")
    if not isinstance(spacing, (list, tuple)):
        spacing = (spacing,) * d

    # dtype policy: bf16 stays bf16 end-to-end (native MXU operands, halves HBM/VMEM
    # bytes); other floats compute in f32; integer inputs stay native on the HBM wire,
    # are cast in-kernel, and produce f32 output (matches CUDA float kernels).
    if I.dtype == jnp.bfloat16:
        compute_dtype = jnp.bfloat16
        out_dtype = jnp.bfloat16
    elif jnp.issubdtype(I.dtype, jnp.floating):
        compute_dtype = jnp.float32
        out_dtype = I.dtype
    else:
        compute_dtype = jnp.float32
        out_dtype = jnp.float32
    wire_dtype = I.dtype

    # Tiny separable weights (VMEM-resident) — no kron blow-up, no size cap.
    wyt = _interp_matrix_t(Hout, Hin, float(origin[0]), float(spacing[0]), compute_dtype)
    wxt = _interp_matrix_t(Wout, Win, float(origin[1]), float(spacing[1]), compute_dtype)

    B = N * C
    I3 = I.reshape(B, Hin, Win)

    # ---- VMEM budget (generation-aware: v5e/v6e 128 MiB, v7x 64 MiB) ----
    try:
        vmem_cap = int(pltpu.get_tpu_info().vmem_capacity_bytes)
    except Exception:
        vmem_cap = 64 << 20                        # conservative (v7x) fallback
    budget = max(vmem_cap - (8 << 20), 16 << 20)   # leave ~8 MiB headroom

    w_bytes = 2 * (_tile_bytes(1, Win, Wout, compute_dtype)
                   + _tile_bytes(1, Hin, Hout, compute_dtype))  # (double-buffered, tiny)

    def est_vmem(bt):
        io = (2 * _tile_bytes(bt, Hin, Win, wire_dtype)         # double-buffered in tile
              + 2 * _tile_bytes(bt, Hout, Wout, out_dtype))     # double-buffered out tile
        tmp = (2 * _tile_bytes(bt, Hin, Wout, jnp.float32)      # in-kernel intermediates
               + 2 * _tile_bytes(bt, Hout, Wout, jnp.float32))
        return io + tmp + w_bytes + (2 << 20)

    # ---- Batch tiling: balanced split (no pathological padding), >=2 tiles when
    # worthwhile so v7x's second TensorCore gets work, shrink tile if VMEM-bound.
    pack = 8
    max_rows = 512
    if B > max_rows:
        num_tiles = _cdiv(B, max_rows)
    elif B > pack:
        num_tiles = 2
    else:
        num_tiles = 1

    def pick_bt(nt):
        bt = _cdiv(B, nt)
        if bt > pack:
            bt = _round_up(bt, pack)
        return bt

    Bt = pick_bt(num_tiles)
    while est_vmem(Bt) > budget and Bt > 1:
        num_tiles += 1
        Bt = pick_bt(num_tiles)
    if est_vmem(Bt) > budget:
        # TODO(synk): very large single images need additional spatial (H) tiling.
        raise NotImplementedError("regrid: single-image tile does not fit in VMEM")
    B_pad = num_tiles * Bt

    if B_pad != B:
        I3 = jnp.pad(I3, ((0, B_pad - B), (0, 0), (0, 0)))

    vmem_limit = int(min(budget, max(est_vmem(Bt) + (4 << 20), 32 << 20)))

    out3 = pl.pallas_call(
        _regrid_kernel,
        out_shape=jax.ShapeDtypeStruct((B_pad, Hout, Wout), out_dtype),
        grid_spec=pltpu.PrefetchScalarGridSpec(
            num_scalar_prefetch=0,
            grid=(num_tiles,),
            in_specs=[
                pl.BlockSpec((Bt, Hin, Win), lambda b: (b, 0, 0)),
                pl.BlockSpec((Win, Wout), lambda b: (0, 0)),   # resident weight (constant map)
                pl.BlockSpec((Hin, Hout), lambda b: (0, 0)),   # resident weight (constant map)
            ],
            out_specs=pl.BlockSpec((Bt, Hout, Wout), lambda b: (b, 0, 0)),
        ),
        compiler_params=pltpu.CompilerParams(
            dimension_semantics=("parallel",),
            vmem_limit_bytes=vmem_limit,
        ),
    )(I3, wxt, wyt)

    return out3[:B].reshape(N, C, Hout, Wout)


class RegridModule:
    """JAX/Pallas port of lagomorph's RegridModule (forward only, 2-D NCHW)."""

    def __init__(self, shape, origin=None, spacing=None):
        self.shape = shape
        self.origin = origin
        self.spacing = spacing
        # TODO(synk): backward pass (regrid_backward adjoint splatting) not implemented.
        # TODO(synk): 3-D volumes and the displacement=True rescaling branch not implemented.

    def __call__(self, I):
        return regrid_forward(I, self.shape, self.origin, self.spacing)


def _regrid_reference(I, outshape):
    """Plain-JAX reference (separable formulation) for verification."""
    N, C, Hin, Win = I.shape
    Hout, Wout = outshape
    origin = ((Hin - 1) * 0.5, (Win - 1) * 0.5)
    spacing = ((Hin - 1) / max(Hout - 1, 1), (Win - 1) / max(Wout - 1, 1))
    wyt = _interp_matrix_t(Hout, Hin, origin[0], spacing[0], jnp.float32)  # (Hin, Hout)
    wxt = _interp_matrix_t(Wout, Win, origin[1], spacing[1], jnp.float32)  # (Win, Wout)
    return jnp.einsum('po,ncpq,qw->ncow', wyt, I.astype(jnp.float32), wxt)


if __name__ == "__main__":
    key = jax.random.PRNGKey(0)

    # Case 1: common use case — upscale 16x16 -> 32x32, NCHW float32 (single tile).
    N, C, Hin, Win = 2, 4, 16, 16
    out_shape = (32, 32)
    I = jax.random.normal(key, (N, C, Hin, Win), dtype=jnp.float32)
    module = RegridModule(shape=out_shape, origin=None, spacing=None)
    out = jax.block_until_ready(module(I))
    ref = _regrid_reference(I, out_shape)
    assert out.shape == (N, C, out_shape[0], out_shape[1])
    assert out.dtype == I.dtype
    assert jnp.allclose(out.astype(jnp.float32), ref, atol=1e-5, rtol=1e-5)

    # Case 2: multi-tile grid + batch padding path (B = 9 -> 2 tiles of 5, 1 pad row).
    I2 = jax.random.normal(jax.random.PRNGKey(1), (3, 3, 16, 16), dtype=jnp.float32)
    out2 = jax.block_until_ready(regrid_forward(I2, (24, 24)))
    ref2 = _regrid_reference(I2, (24, 24))
    assert out2.shape == (3, 3, 24, 24)
    assert jnp.allclose(out2.astype(jnp.float32), ref2, atol=1e-5, rtol=1e-5)

    # Case 3: bf16 wire dtype -> native bf16 MXU operands (looser tolerance).
    I3 = I.astype(jnp.bfloat16)
    out3 = jax.block_until_ready(module(I3))
    ref3 = _regrid_reference(I3.astype(jnp.float32), out_shape)
    assert out3.dtype == jnp.bfloat16
    assert jnp.allclose(out3.astype(jnp.float32), ref3, atol=5e-2, rtol=5e-2)

    print("KERNEL_OK")
</pallas_src>

<mosaic_0001>
module attributes {stable_mosaic.version = 11 : i64} {
  func.func @_regrid_kernel(%arg0: i32, %arg1: memref<8x16x16xf32, #tpu.memory_space<vmem>>, %arg2: memref<16x32xf32, #tpu.memory_space<vmem>>, %arg3: memref<16x32xf32, #tpu.memory_space<vmem>>, %arg4: memref<8x32x32xf32, #tpu.memory_space<vmem>>) attributes {dimension_semantics = [#tpu.dimension_semantics<parallel>], iteration_bounds = array<i64: 1>, scalar_prefetch = 0 : i64, scratch_operands = 0 : i64, tpu.core_type = #tpu.core_type<tc>, window_params = [{transform_indices = @transform_0, window_bounds = array<i64: 8, 16, 16>}, {pipeline_mode = #tpu.pipeline_mode<synchronous>, transform_indices = @transform_1, window_bounds = array<i64: 16, 32>}, {pipeline_mode = #tpu.pipeline_mode<synchronous>, transform_indices = @transform_2, window_bounds = array<i64: 16, 32>}, {transform_indices = @transform_3, window_bounds = array<i64: 8, 32, 32>}]} {
    %c0 = arith.constant 0 : index
    %c0_0 = arith.constant 0 : index
    %c0_1 = arith.constant 0 : index
    %0 = vector.load %arg1[%c0, %c0_0, %c0_1] : memref<8x16x16xf32, #tpu.memory_space<vmem>>, vector<8x16x16xf32>
    %1 = vector.shape_cast %0 : vector<8x16x16xf32> to vector<128x16xf32>
    %c0_2 = arith.constant 0 : index
    %c0_3 = arith.constant 0 : index
    %2 = vector.load %arg2[%c0_2, %c0_3] : memref<16x32xf32, #tpu.memory_space<vmem>>, vector<16x32xf32>
    %cst = arith.constant dense<0.000000e+00> : vector<128x32xf32>
    %3 = tpu.matmul %1, %2, %cst {dimension_numbers = #tpu.dot_dimension_numbers<[1], [0], [0], [1], [0, 0, 1, 1], [], []>} : vector<128x16xf32>, vector<16x32xf32>, vector<128x32xf32> -> vector<128x32xf32>
    %4 = vector.shape_cast %3 : vector<128x32xf32> to vector<8x16x32xf32>
    %5 = tpu.transpose %4, [0, 2, 1] : vector<8x16x32xf32> -> vector<8x32x16xf32>
    %6 = vector.shape_cast %5 : vector<8x32x16xf32> to vector<256x16xf32>
    %c0_4 = arith.constant 0 : index
    %c0_5 = arith.constant 0 : index
    %7 = vector.load %arg3[%c0_4, %c0_5] : memref<16x32xf32, #tpu.memory_space<vmem>>, vector<16x32xf32>
    %cst_6 = arith.constant dense<0.000000e+00> : vector<256x32xf32>
    %8 = tpu.matmul %6, %7, %cst_6 {dimension_numbers = #tpu.dot_dimension_numbers<[1], [0], [0], [1], [0, 0, 1, 1], [], []>} : vector<256x16xf32>, vector<16x32xf32>, vector<256x32xf32> -> vector<256x32xf32>
    %9 = vector.shape_cast %8 : vector<256x32xf32> to vector<8x32x32xf32>
    %10 = tpu.transpose %9, [0, 2, 1] : vector<8x32x32xf32> -> vector<8x32x32xf32>
    %c0_7 = arith.constant 0 : index
    %c0_8 = arith.constant 0 : index
    %c0_9 = arith.constant 0 : index
    %11 = vector.load %arg4[%c0_7, %c0_8, %c0_9] : memref<8x32x32xf32, #tpu.memory_space<vmem>>, vector<8x32x32xf32>
    tpu.vector_store %arg4[%c0_7, %c0_8, %c0_9], %10 {strides = array<i32>} : memref<8x32x32xf32, #tpu.memory_space<vmem>>, vector<8x32x32xf32>,
    return
  }
  func.func @transform_0(%arg0: i32) -> (i32, i32, i32) {
    %c0_i32 = arith.constant 0 : i32
    %c0_i32_0 = arith.constant 0 : i32
    %c0_i32_1 = arith.constant 0 : i32
    return %arg0, %c0_i32, %c0_i32_0 : i32, i32, i32
  }
  func.func @transform_1(%arg0: i32) -> (i32, i32) {
    %c0_i32 = arith.constant 0 : i32
    %c0_i32_0 = arith.constant 0 : i32
    %c0_i32_1 = arith.constant 0 : i32
    return %c0_i32, %c0_i32_0 : i32, i32
  }
  func.func @transform_2(%arg0: i32) -> (i32, i32) {
    %c0_i32 = arith.constant 0 : i32
    %c0_i32_0 = arith.constant 0 : i32
    %c0_i32_1 = arith.constant 0 : i32
    return %c0_i32, %c0_i32_0 : i32, i32
  }
  func.func @transform_3(%arg0: i32) -> (i32, i32, i32) {
    %c0_i32 = arith.constant 0 : i32
    %c0_i32_0 = arith.constant 0 : i32
    %c0_i32_1 = arith.constant 0 : i32
    return %arg0, %c0_i32, %c0_i32_0 : i32, i32, i32
  }
}

</mosaic_0001>

<bundles_post_ra>
// kernel: tpu_custom_call.1
= control target key start
LH: loop header
LB: loop body
LE: loop exit
PB: predicated region body
PF: predicated region fallthrough
CT: control target
= control target key end

     0   :  { %8 = vsyncpa [#allocation3], 0  ;;  %s1618_s0 = inlined_call_operand.hbm [shape: f32[8,16,16], index: 0, kind: input, shape index: {}]   ;;  %s1619_s1 = inlined_call_operand.hbm [shape: f32[16,32], index: 1, kind: input, shape index: {}]   ;;  %s1620_s2 = inlined_call_operand.hbm [shape: f32[16,32], index: 2, kind: input, shape index: {}]   ;;  %s1621_s3 = inlined_call_operand.hbm [shape: f32[8,32,32], index: 3, kind: output, shape index: {}]  }
   0x1   :  { %9 = vsyncpa [#allocation6], 0 }
   0x2   :  { %10 = vsyncpa [#allocation4], 0  ;;  %s1445_s12 = smov [#allocation5]   ;;  %s1446_s14 = smov [#allocation2]  }
   0x3   :  { %s28_s13 = sshll.u32 %s1445_s12, 4  ;;  %s16_s15 = sshll.u32 %s1446_s14, 4  ;;  %s29_s13 = int_to_ptr.vmem [resolvable:$true] %s28_s13  ;;  %s1471_s15 = int_to_ptr.vmem [resolvable:$true] %s16_s15 }
   0x4   :  { %s1351_s18 = scalar_lea.hbm %s1619_s1, 256 }
   0x5   :  { %p1352_p0 = scmp.ne.s32.totalorder %s1619_s1, %s1351_s18  ;;  %p1355_p1 = scmp.lt.u32.totalorder %s1351_s18, %s1619_s1 }
   0x7   :  { %p1357_p2 = pnand %p1355_p1, %p1352_p0 }
   0x9   :  { %1360 = shalt.err (!%p1357_p2)
}
   0xa   :  { %s1361_s23 = scalar_lea.vmem %s29_s13, 256  ;;  %p1366_p4 = scmp.lt.s32.totalorder %s29_s13, %s29_s13 }
   0xb   :  { %p1362_p3 = scmp.ne.s32.totalorder %s29_s13, %s1361_s23  ;;  %p1367_p5 = scmp.lt.s32.totalorder %s1361_s23, %s1361_s23 }
   0xd   :  { %p1368_p6 = por %p1367_p5, %p1366_p4 }
   0xf   :  { %p1369_p7 = pnand %p1368_p6, %p1362_p3 }
  0x11   :  { %1372 = shalt.err (!%p1369_p7)
}
  0x12   :  { %s1447_s24 = smov 128   ;;  %s1448_s25 = smov 8  }
  0x13   :  { %34 = dma.hbm_to_vmem [thread:$0]  %s1619_s1, 256, %s29_s13, [#allocation6], %s1447_s24, %s1447_s24, %s1448_s25  }
  0x14   :  { %s1373_s30 = scalar_lea.hbm %s1618_s0, 2048 }
  0x15   :  { %p1374_p8 = scmp.ne.s32.totalorder %s1618_s0, %s1373_s30  ;;  %p1377_p9 = scmp.lt.u32.totalorder %s1373_s30, %s1618_s0 }
  0x17   :  { %p1379_p10 = pnand %p1377_p9, %p1374_p8 }
  0x19   :  { %1382 = shalt.err (!%p1379_p10)
}
  0x1a   :  { %s1383_s8 = scalar_lea.vmem %s1471_s15, 2048  ;;  %p1388_p12 = scmp.lt.s32.totalorder %s1471_s15, %s1471_s15 }
  0x1b   :  { %p1384_p11 = scmp.ne.s32.totalorder %s1471_s15, %s1383_s8  ;;  %p1389_p13 = scmp.lt.s32.totalorder %s1383_s8, %s1383_s8 }
  0x1d   :  { %p1390_p0 = por %p1389_p13, %p1388_p12 }
  0x1f   :  { %p1391_p1 = pnand %p1390_p0, %p1384_p11 }
  0x21   :  { %1394 = shalt.err (!%p1391_p1)
}
  0x22   :  { %22 = dma.hbm_to_vmem [thread:$0]  %s1618_s0, 2048, %s1471_s15, [#allocation3], %s1447_s24, %s1447_s24, %s1448_s25  }
  0x23   :  { %s1449_s10 = smov [#allocation7]   ;;  %s1395_s14 = scalar_lea.hbm %s1620_s2, 256 }
  0x24   :  { %s40_s11 = sshll.u32 %s1449_s10, 4  ;;  %p1396_p2 = scmp.ne.s32.totalorder %s1620_s2, %s1395_s14  ;;  %s41_s11 = int_to_ptr.vmem [resolvable:$true] %s40_s11 }
  0x25   :  { %p1399_p3 = scmp.lt.u32.totalorder %s1395_s14, %s1620_s2 }
  0x27   :  { %p1401_p4 = pnand %p1399_p3, %p1396_p2 }
  0x29   :  { %1404 = shalt.err (!%p1401_p4)
}
  0x2a   :  { %s1405_s20 = scalar_lea.vmem %s41_s11, 256  ;;  %p1410_p6 = scmp.lt.s32.totalorder %s41_s11, %s41_s11 }
  0x2b   :  { %p1406_p5 = scmp.ne.s32.totalorder %s41_s11, %s1405_s20  ;;  %p1411_p7 = scmp.lt.s32.totalorder %s1405_s20, %s1405_s20 }
  0x2d   :  { %p1412_p8 = por %p1411_p7, %p1410_p6 }
  0x2f   :  { %p1413_p9 = pnand %p1412_p8, %p1406_p5 }
  0x31   :  { %1416 = shalt.err (!%p1413_p9)
}
  0x32   :  { %46 = dma.hbm_to_vmem [thread:$0]  %s1620_s2, 256, %s41_s11, [#allocation6], %s1447_s24, %s1447_s24, %s1448_s25  }
  0x33   :  { %1439 = dma.done.wait [#allocation3], 2048  }
  0x34   :  { %1440 = vsyncadd [#allocation3], 4294965248 }
  0x35   :  { %1441 = dma.done.wait [#allocation6], 512  }
  0x36   :  { %1442 = vsyncadd [#allocation6], 4294966784  ;;  %vm74_vm0 = vcmask 130048   ;;  %v72_v0 = vld [vmem:[#allocation5] sm:$0xff]  ;;  %v73_v1 = vld [vmem:[#allocation5 + $0x8] sm:$0xff]  ;;  %vm1103_vm1 = vcmask 261120  }
  0x37   :  { %v56_v2 = vld [vmem:[#allocation2] sm:$0xff]  ;;  %v1334_v3 = vpack.c.bf16 %v73_v1, %v72_v0  ;;  %v57_v4 = vld [vmem:[#allocation2 + $0x8] sm:$0xff]  ;;  %v58_v5 = vld [vmem:[#allocation2 + $0x10] sm:$0xff]  ;;  %s1450_s2 = smov [#allocation8]  }
  0x38   :  { %1258 = vmatprep.mubr.msk.f32.mxu0 %vm74_vm0, %v56_v2  ;;  %v59_v6 = vld [vmem:[#allocation2 + $0x18] sm:$0xff]  ;;  %v60_v7 = vld [vmem:[#allocation2 + $0x20] sm:$0xff]  ;;  %v61_v8 = vld [vmem:[#allocation2 + $0x28] sm:$0xff]  ;;  %s1141_s21 = sshll.u32 %s1450_s2, 4  ;;  %s1142_s21 = int_to_ptr.vmem [resolvable:$true] %s1141_s21 }
  0x39   :  { %1335 = vmatprep.subr.bf16.mxu0 %v1334_v3  ;;  %v62_v9 = vld [vmem:[#allocation2 + $0x30] sm:$0xff]  ;;  %v63_v10 = vld [vmem:[#allocation2 + $0x38] sm:$0xff]  ;;  %v64_v11 = vld [vmem:[#allocation2 + $0x40] sm:$0xff]  ;;  %s1417_s22 = scalar_lea.vmem %s1142_s21, 4096  ;;  %p1422_p11 = scmp.lt.s32.totalorder %s1142_s21, %s1142_s21 }
  0x3a   :  { %1337 = vmatpush3.bf16.msra.mxu0 %v1334_v3  ;;  %v65_v12 = vld [vmem:[#allocation2 + $0x48] sm:$0xff]  ;;  %v66_v13 = vld [vmem:[#allocation2 + $0x50] sm:$0xff]  ;;  %v67_v14 = vld [vmem:[#allocation2 + $0x58] sm:$0xff]  ;;  %p1418_p10 = scmp.ne.s32.totalorder %s1142_s21, %s1417_s22  ;;  %p1423_p12 = scmp.lt.s32.totalorder %s1417_s22, %s1417_s22 }
  0x3b   :  { %v68_v15 = vld [vmem:[#allocation2 + $0x60] sm:$0xff]  ;;  %v69_v16 = vld [vmem:[#allocation2 + $0x68] sm:$0xff]  ;;  %v70_v17 = vld [vmem:[#allocation2 + $0x70] sm:$0xff] }
  0x3c   :  { %v71_v18 = vld [vmem:[#allocation2 + $0x78] sm:$0xff]  ;;  %v524_v24 = vld [vmem:[#allocation7] sm:$0xff]  ;;  %p1424_p13 = por %p1423_p12, %p1422_p11 }
  0x3d   :  { %1259 = vmatmul.mubr.msk.f32.vlgmr.msra.gmra.mrb[0].mxu0 %vm74_vm0, %v57_v4  ;;  %v525_v25 = vld [vmem:[#allocation7 + $0x8] sm:$0xff] }
  0x3e   :  { %1261 = vmatprep.mubr.msk.f32.mxu0 %vm74_vm0, %v58_v5  ;;  %v1338_v27 = vpack.c.bf16 %v525_v25, %v524_v24  ;;  %p1425_p0 = pnand %p1424_p13, %p1418_p10 }
  0x40   :  { %1342 = vmatprep.subr.bf16.mxu1 %v1338_v27  ;;  %1339 = vmatprep.subr.bf16.mxu0 %v1338_v27 }
  0x41   :  { %1262 = vmatmul.mubr.msk.f32.gmra.mrb[2].mxu0 %vm74_vm0, %v59_v6  ;;  %1343 = vmatpush3.bf16.msra.mxu1 %v1338_v27 }
  0x42   :  { %1264 = vmatprep.mubr.msk.f32.mxu0 %vm74_vm0, %v60_v7  ;;  %1341 = vmatpush3.bf16.msra.mxu0 %v1338_v27 }
  0x45   :  { %1265 = vmatmul.mubr.msk.f32.gmra.mrb[4].mxu0 %vm74_vm0, %v61_v8 }
  0x46   :  { %1267 = vmatprep.mubr.msk.f32.mxu0 %vm74_vm0, %v62_v9 }
  0x49   :  { %1268 = vmatmul.mubr.msk.f32.gmra.mrb[6].mxu0 %vm74_vm0, %v63_v10 }
  0x4a   :  { %1270 = vmatprep.mubr.msk.f32.mxu0 %vm74_vm0, %v64_v11 }
  0x4d   :  { %1271 = vmatmul.mubr.msk.f32.gmra.mrb[8].mxu0 %vm74_vm0, %v65_v12 }
  0x4e   :  { %1273 = vmatprep.mubr.msk.f32.mxu0 %vm74_vm0, %v66_v13 }
  0x51   :  { %1274 = vmatmul.mubr.msk.f32.gmra.mrb[10].mxu0 %vm74_vm0, %v67_v14 }
  0x52   :  { %1276 = vmatprep.mubr.msk.f32.mxu0 %vm74_vm0, %v68_v15 }
  0x55   :  { %1277 = vmatmul.mubr.msk.f32.gmra.mrb[12].mxu0 %vm74_vm0, %v69_v16 }
  0x56   :  { %1279 = vmatprep.mubr.msk.f32.mxu0 %vm74_vm0, %v70_v17 }
  0x59   :  { %1280 = vmatmul.mubr.msk.f32.gmra.mrb[14].mxu0 %vm74_vm0, %v71_v18 }
 0x110   :  { %v1260_v19 = vpop.f32.mrb[0].mxu0 }
 0x111   :  { %v189_v20 = vpop.f32.mrb[1].mxu0 }
 0x114   :  { %v1263_v21 = vpop.f32.mrb[2].mxu0 }
 0x115   :  { %v199_v22 = vpop.f32.mrb[3].mxu0 }
 0x118   :  { %v1266_v23 = vpop.f32.mrb[4].mxu0 }
 0x119   :  { %v209_v26 = vpop.f32.mrb[5].mxu0 }
 0x11a   :  { %332 = vxpose.xlu0.b32.start [1/2] (short) (narrow) %v209_v26, 32 }
 0x11c   :  { %v1269_v28 = vpop.f32.mrb[6].mxu0 }
 0x11d   :  { %v219_v29 = vpop.f32.mrb[7].mxu0 }
 0x11e   :  { %333 = vxpose.xlu0.b32.end [2/2] (short) (narrow) %v1266_v23, 32  ;;  %364 = vxpose.xlu1.b32.start [1/2] (short) (narrow) %v219_v29, 32 }
 0x120   :  { %v1272_v30 = vpop.f32.mrb[8].mxu0 }
 0x121   :  { %v229_v31 = vpop.f32.mrb[9].mxu0 }
 0x122   :  { %365 = vxpose.xlu1.b32.end [2/2] (short) (narrow) %v1269_v28, 32 }
 0x124   :  { %v1275_v32 = vpop.f32.mrb[10].mxu0 }
 0x125   :  { %v239_v33 = vpop.f32.mrb[11].mxu0 }
 0x127   :  { %396 = vxpose.xlu0.b32.start [1/2] (short) (narrow) %v229_v31, 32 }
 0x128   :  { %v1278_v34 = vpop.f32.mrb[12].mxu0 }
 0x129   :  { %v249_v35 = vpop.f32.mrb[13].mxu0 }
 0x12b   :  { %397 = vxpose.xlu0.b32.end [2/2] (short) (narrow) %v1272_v30, 32  ;;  %428 = vxpose.xlu1.b32.start [1/2] (short) (narrow) %v239_v33, 32 }
 0x12c   :  { %v1281_v36 = vpop.f32.mrb[14].mxu0 }
 0x12d   :  { %v259_v37 = vpop.f32.mrb[15].mxu0 }
 0x12f   :  { %429 = vxpose.xlu1.b32.end [2/2] (short) (narrow) %v1275_v32, 32 }
 0x134   :  { %268 = vxpose.xlu0.b32.start [1/2] (short) (narrow) %v189_v20, 32 }
 0x138   :  { %269 = vxpose.xlu0.b32.end [2/2] (short) (narrow) %v1260_v19, 32  ;;  %460 = vxpose.xlu1.b32.start [1/2] (short) (narrow) %v249_v35, 32 }
 0x13c   :  { %461 = vxpose.xlu1.b32.end [2/2] (short) (narrow) %v1278_v34, 32 }
 0x141   :  { %300 = vxpose.xlu0.b32.start [1/2] (short) (narrow) %v199_v22, 32 }
 0x145   :  { %301 = vxpose.xlu0.b32.end [2/2] (short) (narrow) %v1263_v21, 32  ;;  %492 = vxpose.xlu1.b32.start [1/2] (short) (narrow) %v259_v37, 32 }
 0x149   :  { %493 = vxpose.xlu1.b32.end [2/2] (short) (narrow) %v1281_v36, 32 }
 0x19a   :  { %v348_v38 = vpop.trf.xlu0 }
 0x19b   :  { %1298 = vmatprep.mubr.msk.f32.mxu1 %vm74_vm0, %v348_v38 }
 0x19e   :  { %v349_v39 = vpop.trf.xlu0  ;;  %v380_v40 = vpop.trf.xlu1 }
 0x19f   :  { %1299 = vmatmul.mubr.msk.f32.vlgmr.msra.gmra.mrb[0].mxu1 %vm74_vm0, %v349_v39 }
 0x1a2   :  { %v350_v41 = vpop.trf.xlu0  ;;  %v381_v42 = vpop.trf.xlu1 }
 0x1a3   :  { %1301 = vmatprep.mubr.msk.f32.mxu1 %vm74_vm0, %v350_v41 }
 0x1a6   :  { %v351_v43 = vpop.trf.xlu0  ;;  %v382_v44 = vpop.trf.xlu1 }
 0x1a7   :  { %1302 = vmatmul.mubr.msk.f32.gmra.mrb[2].mxu1 %vm74_vm0, %v351_v43 }
 0x1a8   :  { %1304 = vmatprep.mubr.msk.f32.mxu1 %vm74_vm0, %v380_v40 }
 0x1aa   :  { %v412_v45 = vpop.trf.xlu0  ;;  %v383_v46 = vpop.trf.xlu1 }
 0x1ab   :  { %1305 = vmatmul.mubr.msk.f32.gmra.mrb[4].mxu1 %vm74_vm0, %v381_v42 }
 0x1ac   :  { %1307 = vmatprep.mubr.msk.f32.mxu1 %vm74_vm0, %v382_v44 }
 0x1ae   :  { %v413_v47 = vpop.trf.xlu0  ;;  %v444_v48 = vpop.trf.xlu1 }
 0x1af   :  { %1308 = vmatmul.mubr.msk.f32.gmra.mrb[6].mxu1 %vm74_vm0, %v383_v46 }
 0x1b0   :  { %1310 = vmatprep.mubr.msk.f32.mxu1 %vm74_vm0, %v412_v45 }
 0x1b2   :  { %v414_v49 = vpop.trf.xlu0  ;;  %v445_v50 = vpop.trf.xlu1 }
 0x1b3   :  { %1311 = vmatmul.mubr.msk.f32.gmra.mrb[8].mxu1 %vm74_vm0, %v413_v47 }
 0x1b4   :  { %1313 = vmatprep.mubr.msk.f32.mxu1 %vm74_vm0, %v414_v49 }
 0x1b6   :  { %v415_v51 = vpop.trf.xlu0  ;;  %v446_v52 = vpop.trf.xlu1 }
 0x1b7   :  { %1314 = vmatmul.mubr.msk.f32.gmra.mrb[10].mxu1 %vm74_vm0, %v415_v51 }
 0x1b8   :  { %1316 = vmatprep.mubr.msk.f32.mxu1 %vm74_vm0, %v444_v48 }
 0x1ba   :  { %v284_v53 = vpop.trf.xlu0  ;;  %v447_v54 = vpop.trf.xlu1 }
 0x1bb   :  { %1286 = vmatprep.mubr.msk.f32.mxu0 %vm74_vm0, %v284_v53  ;;  %1317 = vmatmul.mubr.msk.f32.gmra.mrb[12].mxu1 %vm74_vm0, %v445_v50 }
 0x1bc   :  { %1319 = vmatprep.mubr.msk.f32.mxu1 %vm74_vm0, %v446_v52 }
 0x1be   :  { %v285_v55 = vpop.trf.xlu0  ;;  %v476_v56 = vpop.trf.xlu1 }
 0x1bf   :  { %1287 = vmatmul.mubr.msk.f32.vlgmr.msra.gmra.mrb[16].mxu0 %vm74_vm0, %v285_v55  ;;  %1320 = vmatmul.mubr.msk.f32.gmra.mrb[14].mxu1 %vm74_vm0, %v447_v54 }
 0x1c0   :  { %1322 = vmatprep.mubr.msk.f32.mxu1 %vm74_vm0, %v476_v56 }
 0x1c2   :  { %v286_v57 = vpop.trf.xlu0  ;;  %v477_v58 = vpop.trf.xlu1 }
 0x1c3   :  { %1289 = vmatprep.mubr.msk.f32.mxu0 %vm74_vm0, %v286_v57  ;;  %1323 = vmatmul.mubr.msk.f32.gmra.mrb[16].mxu1 %vm74_vm0, %v477_v58 }
 0x1c6   :  { %v287_v59 = vpop.trf.xlu0  ;;  %v478_v60 = vpop.trf.xlu1 }
 0x1c7   :  { %1290 = vmatmul.mubr.msk.f32.gmra.mrb[18].mxu0 %vm74_vm0, %v287_v59  ;;  %1325 = vmatprep.mubr.msk.f32.mxu1 %vm74_vm0, %v478_v60 }
 0x1ca   :  { %v316_v61 = vpop.trf.xlu0  ;;  %v479_v62 = vpop.trf.xlu1 }
 0x1cb   :  { %1292 = vmatprep.mubr.msk.f32.mxu0 %vm74_vm0, %v316_v61  ;;  %1326 = vmatmul.mubr.msk.f32.gmra.mrb[18].mxu1 %vm74_vm0, %v479_v62 }
 0x1ce   :  { %v317_v63 = vpop.trf.xlu0  ;;  %v508_v0 = vpop.trf.xlu1 }
 0x1cf   :  { %1293 = vmatmul.mubr.msk.f32.gmra.mrb[20].mxu0 %vm74_vm0, %v317_v63  ;;  %1328 = vmatprep.mubr.msk.f32.mxu1 %vm74_vm0, %v508_v0 }
 0x1d2   :  { %v318_v1 = vpop.trf.xlu0  ;;  %v509_v2 = vpop.trf.xlu1 }
 0x1d3   :  { %1295 = vmatprep.mubr.msk.f32.mxu0 %vm74_vm0, %v318_v1  ;;  %1329 = vmatmul.mubr.msk.f32.gmra.mrb[20].mxu1 %vm74_vm0, %v509_v2 }
 0x1d6   :  { %v319_v3 = vpop.trf.xlu0  ;;  %v510_v4 = vpop.trf.xlu1 }
 0x1d7   :  { %1296 = vmatmul.mubr.msk.f32.gmra.mrb[22].mxu0 %vm74_vm0, %v319_v3  ;;  %1331 = vmatprep.mubr.msk.f32.mxu1 %vm74_vm0, %v510_v4 }
 0x1da   :  { %v511_v5 = vpop.trf.xlu1 }
 0x1db   :  { %1332 = vmatmul.mubr.msk.f32.gmra.mrb[22].mxu1 %vm74_vm0, %v511_v5 }
 0x272   :  { %v1300_v6 = vpop.f32.mrb[0].mxu1 }
 0x273   :  { %v728_v7 = vpop.f32.mrb[1].mxu1 }
 0x27a   :  { %v1303_v8 = vpop.f32.mrb[2].mxu1 }
 0x27b   :  { %v738_v9 = vpop.f32.mrb[3].mxu1 }
 0x27e   :  { %v1306_v10 = vpop.f32.mrb[4].mxu1 }
 0x27f   :  { %v748_v11 = vpop.f32.mrb[5].mxu1 }
 0x282   :  { %v1309_v12 = vpop.f32.mrb[6].mxu1 }
 0x283   :  { %v758_v13 = vpop.f32.mrb[7].mxu1 }
 0x286   :  { %v1312_v14 = vpop.f32.mrb[8].mxu1 }
 0x287   :  { %v768_v15 = vpop.f32.mrb[9].mxu1 }
 0x28a   :  { %v1315_v16 = vpop.f32.mrb[10].mxu1 }
 0x28b   :  { %v778_v17 = vpop.f32.mrb[11].mxu1 }
 0x28e   :  { %v1318_v18 = vpop.f32.mrb[12].mxu1 }
 0x28f   :  { %v788_v19 = vpop.f32.mrb[13].mxu1 }
 0x292   :  { %v1288_v20 = vpop.f32.mrb[16].mxu0  ;;  %v1321_v21 = vpop.f32.mrb[14].mxu1 }
 0x293   :  { %v688_v22 = vpop.f32.mrb[17].mxu0  ;;  %v798_v23 = vpop.f32.mrb[15].mxu1 }
 0x294   :  { %847 = vxpose.xlu0.b32.start [1/4] (short) (narrow) %v688_v22, 32 }
 0x296   :  { %v1324_v24 = vpop.f32.mrb[16].mxu1 }
 0x297   :  { %v808_v25 = vpop.f32.mrb[17].mxu1 }
 0x298   :  { %848 = vxpose.xlu0.b32.cont [2/4] (short) (narrow) %v1288_v20, 32 }
 0x29a   :  { %v1291_v26 = vpop.f32.mrb[18].mxu0 }
 0x29b   :  { %v698_v27 = vpop.f32.mrb[19].mxu0 }
 0x29c   :  { %849 = vxpose.xlu0.b32.cont [3/4] (short) (narrow) %v698_v27, 32 }
 0x29e   :  { %v1327_v28 = vpop.f32.mrb[18].mxu1 }
 0x29f   :  { %v818_v29 = vpop.f32.mrb[19].mxu1 }
 0x2a0   :  { %850 = vxpose.xlu0.b32.end [4/4] (short) (narrow) %v1291_v26, 32 }
 0x2a2   :  { %v1294_v30 = vpop.f32.mrb[20].mxu0 }
 0x2a3   :  { %v708_v31 = vpop.f32.mrb[21].mxu0 }
 0x2a4   :  { %911 = vxpose.xlu0.b32.start [1/4] (short) (narrow) %v728_v7, 32  ;;  %879 = vxpose.xlu1.b32.start [1/4] (short) (narrow) %v708_v31, 32 }
 0x2a6   :  { %v1330_v32 = vpop.f32.mrb[20].mxu1 }
 0x2a7   :  { %v828_v33 = vpop.f32.mrb[21].mxu1 }
 0x2a8   :  { %912 = vxpose.xlu0.b32.cont [2/4] (short) (narrow) %v1300_v6, 32  ;;  %880 = vxpose.xlu1.b32.cont [2/4] (short) (narrow) %v1294_v30, 32 }
 0x2aa   :  { %v1297_v34 = vpop.f32.mrb[22].mxu0 }
 0x2ab   :  { %v718_v35 = vpop.f32.mrb[23].mxu0 }
 0x2ac   :  { %913 = vxpose.xlu0.b32.cont [3/4] (short) (narrow) %v738_v9, 32  ;;  %881 = vxpose.xlu1.b32.cont [3/4] (short) (narrow) %v718_v35, 32 }
 0x2ae   :  { %v1333_v36 = vpop.f32.mrb[22].mxu1 }
 0x2af   :  { %v838_v37 = vpop.f32.mrb[23].mxu1 }
 0x2b0   :  { %914 = vxpose.xlu0.b32.end [4/4] (short) (narrow) %v1303_v8, 32  ;;  %882 = vxpose.xlu1.b32.end [4/4] (short) (narrow) %v1297_v34, 32 }
 0x2b4   :  { %975 = vxpose.xlu0.b32.start [1/4] (short) (narrow) %v768_v15, 32  ;;  %943 = vxpose.xlu1.b32.start [1/4] (short) (narrow) %v748_v11, 32 }
 0x2b8   :  { %976 = vxpose.xlu0.b32.cont [2/4] (short) (narrow) %v1312_v14, 32  ;;  %944 = vxpose.xlu1.b32.cont [2/4] (short) (narrow) %v1306_v10, 32 }
 0x2bc   :  { %977 = vxpose.xlu0.b32.cont [3/4] (short) (narrow) %v778_v17, 32  ;;  %945 = vxpose.xlu1.b32.cont [3/4] (short) (narrow) %v758_v13, 32 }
 0x2c0   :  { %978 = vxpose.xlu0.b32.end [4/4] (short) (narrow) %v1315_v16, 32  ;;  %946 = vxpose.xlu1.b32.end [4/4] (short) (narrow) %v1309_v12, 32 }
 0x2c4   :  { %1039 = vxpose.xlu0.b32.start [1/4] (short) (narrow) %v808_v25, 32  ;;  %1007 = vxpose.xlu1.b32.start [1/4] (short) (narrow) %v788_v19, 32 }
 0x2c8   :  { %1040 = vxpose.xlu0.b32.cont [2/4] (short) (narrow) %v1324_v24, 32  ;;  %1008 = vxpose.xlu1.b32.cont [2/4] (short) (narrow) %v1318_v18, 32 }
 0x2cc   :  { %1041 = vxpose.xlu0.b32.cont [3/4] (short) (narrow) %v818_v29, 32  ;;  %1009 = vxpose.xlu1.b32.cont [3/4] (short) (narrow) %v798_v23, 32 }
 0x2d0   :  { %1042 = vxpose.xlu0.b32.end [4/4] (short) (narrow) %v1327_v28, 32  ;;  %1010 = vxpose.xlu1.b32.end [4/4] (short) (narrow) %v1321_v21, 32 }
 0x2d4   :  { %1071 = vxpose.xlu1.b32.start [1/4] (short) (narrow) %v828_v33, 32 }
 0x2d8   :  { %1072 = vxpose.xlu1.b32.cont [2/4] (short) (narrow) %v1330_v32, 32 }
 0x2dc   :  { %1073 = vxpose.xlu1.b32.cont [3/4] (short) (narrow) %v838_v37, 32 }
 0x2e0   :  { %1074 = vxpose.xlu1.b32.end [4/4] (short) (narrow) %v1333_v36, 32 }
 0x314   :  { %v863_v38 = vpop.trf.xlu0 }
 0x315   :  { %1104 = vst.msk [vmem:[#allocation8] sm:$0xff] %vm1103_vm1, %v863_v38 }
 0x318   :  { %v864_v39 = vpop.trf.xlu0 }
 0x319   :  { %1105 = vst.msk [vmem:[#allocation8 + $0x8] sm:$0xff] %vm1103_vm1, %v864_v39 }
 0x31c   :  { %v865_v40 = vpop.trf.xlu0 }
 0x31d   :  { %1106 = vst.msk [vmem:[#allocation8 + $0x10] sm:$0xff] %vm1103_vm1, %v865_v40 }
 0x320   :  { %v866_v41 = vpop.trf.xlu0 }
 0x321   :  { %1107 = vst.msk [vmem:[#allocation8 + $0x18] sm:$0xff] %vm1103_vm1, %v866_v41 }
 0x324   :  { %v895_v42 = vpop.trf.xlu1  ;;  %v927_v43 = vpop.trf.xlu0 }
 0x325   :  { %1108 = vst.msk [vmem:[#allocation8 + $0x20] sm:$0xff] %vm1103_vm1, %v895_v42  ;;  %1112 = vst.msk [vmem:[#allocation8 + $0x40] sm:$0xff] %vm1103_vm1, %v927_v43 }
 0x328   :  { %v896_v44 = vpop.trf.xlu1  ;;  %v928_v45 = vpop.trf.xlu0 }
 0x329   :  { %1109 = vst.msk [vmem:[#allocation8 + $0x28] sm:$0xff] %vm1103_vm1, %v896_v44  ;;  %1113 = vst.msk [vmem:[#allocation8 + $0x48] sm:$0xff] %vm1103_vm1, %v928_v45 }
 0x32c   :  { %v897_v46 = vpop.trf.xlu1  ;;  %v929_v47 = vpop.trf.xlu0 }
 0x32d   :  { %1110 = vst.msk [vmem:[#allocation8 + $0x30] sm:$0xff] %vm1103_vm1, %v897_v46  ;;  %1114 = vst.msk [vmem:[#allocation8 + $0x50] sm:$0xff] %vm1103_vm1, %v929_v47 }
 0x330   :  { %v898_v48 = vpop.trf.xlu1  ;;  %v930_v49 = vpop.trf.xlu0 }
 0x331   :  { %1111 = vst.msk [vmem:[#allocation8 + $0x38] sm:$0xff] %vm1103_vm1, %v898_v48  ;;  %1115 = vst.msk [vmem:[#allocation8 + $0x58] sm:$0xff] %vm1103_vm1, %v930_v49 }
 0x334   :  { %v959_v50 = vpop.trf.xlu1  ;;  %v991_v51 = vpop.trf.xlu0 }
 0x335   :  { %1116 = vst.msk [vmem:[#allocation8 + $0x60] sm:$0xff] %vm1103_vm1, %v959_v50  ;;  %1120 = vst.msk [vmem:[#allocation8 + $0x80] sm:$0xff] %vm1103_vm1, %v991_v51 }
 0x338   :  { %v960_v52 = vpop.trf.xlu1  ;;  %v992_v53 = vpop.trf.xlu0 }
 0x339   :  { %1117 = vst.msk [vmem:[#allocation8 + $0x68] sm:$0xff] %vm1103_vm1, %v960_v52  ;;  %1121 = vst.msk [vmem:[#allocation8 + $0x88] sm:$0xff] %vm1103_vm1, %v992_v53 }
 0x33c   :  { %v961_v54 = vpop.trf.xlu1  ;;  %v993_v55 = vpop.trf.xlu0 }
 0x33d   :  { %1118 = vst.msk [vmem:[#allocation8 + $0x70] sm:$0xff] %vm1103_vm1, %v961_v54  ;;  %1122 = vst.msk [vmem:[#allocation8 + $0x90] sm:$0xff] %vm1103_vm1, %v993_v55 }
 0x340   :  { %v962_v56 = vpop.trf.xlu1  ;;  %v994_v57 = vpop.trf.xlu0 }
 0x341   :  { %1119 = vst.msk [vmem:[#allocation8 + $0x78] sm:$0xff] %vm1103_vm1, %v962_v56  ;;  %1123 = vst.msk [vmem:[#allocation8 + $0x98] sm:$0xff] %vm1103_vm1, %v994_v57 }
 0x344   :  { %v1023_v58 = vpop.trf.xlu1  ;;  %v1055_v59 = vpop.trf.xlu0 }
 0x345   :  { %1124 = vst.msk [vmem:[#allocation8 + $0xa0] sm:$0xff] %vm1103_vm1, %v1023_v58  ;;  %1128 = vst.msk [vmem:[#allocation8 + $0xc0] sm:$0xff] %vm1103_vm1, %v1055_v59 }
 0x348   :  { %v1024_v60 = vpop.trf.xlu1  ;;  %v1056_v61 = vpop.trf.xlu0 }
 0x349   :  { %1125 = vst.msk [vmem:[#allocation8 + $0xa8] sm:$0xff] %vm1103_vm1, %v1024_v60  ;;  %1129 = vst.msk [vmem:[#allocation8 + $0xc8] sm:$0xff] %vm1103_vm1, %v1056_v61 }
 0x34c   :  { %v1025_v62 = vpop.trf.xlu1  ;;  %v1057_v63 = vpop.trf.xlu0 }
 0x34d   :  { %1126 = vst.msk [vmem:[#allocation8 + $0xb0] sm:$0xff] %vm1103_vm1, %v1025_v62  ;;  %1130 = vst.msk [vmem:[#allocation8 + $0xd0] sm:$0xff] %vm1103_vm1, %v1057_v63 }
 0x350   :  { %v1026_v0 = vpop.trf.xlu1  ;;  %v1058_v1 = vpop.trf.xlu0 }
 0x351   :  { %1127 = vst.msk [vmem:[#allocation8 + $0xb8] sm:$0xff] %vm1103_vm1, %v1026_v0  ;;  %1131 = vst.msk [vmem:[#allocation8 + $0xd8] sm:$0xff] %vm1103_vm1, %v1058_v1 }
 0x354   :  { %v1087_v2 = vpop.trf.xlu1 }
 0x355   :  { %1132 = vst.msk [vmem:[#allocation8 + $0xe0] sm:$0xff] %vm1103_vm1, %v1087_v2 }
 0x358   :  { %v1088_v3 = vpop.trf.xlu1 }
 0x359   :  { %1133 = vst.msk [vmem:[#allocation8 + $0xe8] sm:$0xff] %vm1103_vm1, %v1088_v3 }
 0x35c   :  { %v1089_v4 = vpop.trf.xlu1 }
 0x35d   :  { %1134 = vst.msk [vmem:[#allocation8 + $0xf0] sm:$0xff] %vm1103_vm1, %v1089_v4 }
 0x360   :  { %v1090_v5 = vpop.trf.xlu1 }
 0x361   :  { %1135 = vst.msk [vmem:[#allocation8 + $0xf8] sm:$0xff] %vm1103_vm1, %v1090_v5 }
 0x362   :  { %1428 = shalt.err (!%p1425_p0)
}
 0x363   :  { %s1429_s27 = scalar_lea.hbm %s1621_s3, 4096 }
 0x364   :  { %p1430_p1 = scmp.ne.s32.totalorder %s1621_s3, %s1429_s27  ;;  %p1433_p2 = scmp.lt.u32.totalorder %s1429_s27, %s1621_s3 }
 0x366   :  { %p1435_p3 = pnand %p1433_p2, %p1430_p1 }
 0x368   :  { %1438 = shalt.err (!%p1435_p3)
}
 0x369   :  { %1147 = dma.vmem_to_hbm [thread:$0]  %s1142_s21, 4096, %s1621_s3, [#allocation4], %s1447_s24, %s1447_s24, %s1448_s25  }
 0x36a   :  { %1443 = dma.done.wait [#allocation4], 4096  }
 0x36b   :  { %1444 = vsyncadd [#allocation4], 4294963200 }
 0x36c   :  { %1151 = vsyncpa [#allocation3], 1 }
 0x36d   :  { %1152 = vsyncpa [#allocation6], 1 }
 0x36e   :  { %1153 = vsyncpa [#allocation4], 1 }

</bundles_post_ra>
